<compile_context>
chip_gen: v7x
topology: tpu7x:2x2x1
jax: 0.10.0
libtpu: 0.0.40
codegen_flags: <defaults>
</compile_context>

<pallas_src>
import functools

import jax
import jax.numpy as jnp
from jax import lax
from jax.experimental import pallas as pl
from jax.experimental.pallas import tpu as pltpu


def _metric_loss_kernel(x_ref, ref_ref, out_ref, m_scr, l_scr, acc_scr,
                        *, inv_denom, mxu_dtype):
    lt = pl.program_id(1)            # location tile index
    j = pl.program_id(2)             # class index (columns of the score matrix)
    n_lt = pl.num_programs(1)
    n_j = pl.num_programs(2)

    # Per-ref accumulator of (logsumexp - correct-class logit), kept un-reduced as a
    # (bs, TL) tile so the inner loop does no cross-lane reductions / scalar RMWs.
    @pl.when((lt == 0) & (j == 0))
    def _():
        acc_scr[...] = jnp.zeros_like(acc_scr)

    # Online-logsumexp running state for the current location tile.
    @pl.when(j == 0)
    def _():
        m_scr[...] = jnp.full_like(m_scr, -jnp.inf)
        l_scr[...] = jnp.zeros_like(l_scr)

    x = x_ref[...]                                   # (bs, n_rkhs)
    w = ref_ref[...]                                 # (n_rkhs, TL) = ref[r, j, :, tile]
    if mxu_dtype is not None:                        # optional bf16 MXU path (v6e/v7x)
        x = x.astype(mxu_dtype)
        w = w.astype(mxu_dtype)

    # s[i, t] = 64 * <x_i, ref[j, :, t]> : scores of every sample i against class j.
    s = jnp.dot(x, w, preferred_element_type=jnp.float32) * 64.0    # (bs, TL) f32

    # Online logsumexp over the class axis j (elementwise over (i, t)).
    m_prev = m_scr[...]
    m_new = jnp.maximum(m_prev, s)
    l_scr[...] = l_scr[...] * jnp.exp(m_prev - m_new) + jnp.exp(s - m_new)
    m_scr[...] = m_new

    # Subtract the correct-class logit: the target of sample i is class i, so only
    # row i == j of this step's scores is "correct".  Pure VPU mask-and-add.
    bs = acc_scr.shape[0]
    row_is_j = lax.broadcasted_iota(jnp.int32, (bs, 1), 0) == j
    acc_scr[...] -= jnp.where(row_is_j, s, 0.0)

    # Finished sweeping classes for this location tile: fold in the logsumexp.
    @pl.when(j == n_j - 1)
    def _():
        acc_scr[...] += m_scr[...] + jnp.log(l_scr[...])

    # Last step for this ref: one reduction + lane-dense store of the partial loss.
    @pl.when((lt == n_lt - 1) & (j == n_j - 1))
    def _():
        out_ref[...] = jnp.zeros_like(out_ref) + jnp.sum(acc_scr[...]) * inv_denom


def _vmem_capacity_bytes():
    try:
        return int(getattr(pltpu.get_tpu_info(), "vmem_capacity_bytes", 128 << 20))
    except Exception:
        return 128 << 20


def _pick_loc_tile(n_loc, n_rkhs, bs, budget_bytes):
    """Largest location tile TL such that the double-buffered (n_rkhs, TL) ref block
    plus the three (bs, TL) f32 scratch tiles stay within budget_bytes.  TL is either
    the full n_loc (block == full dim, always legal) or a lane-aligned divisor."""
    def cost(tl):
        return 4 * (2 * n_rkhs * tl + 3 * bs * tl)
    if cost(n_loc) <= budget_bytes or n_loc < 256:
        return n_loc
    for tl in range((n_loc // 128) * 128, 0, -128):
        if n_loc % tl == 0 and cost(tl) <= budget_bytes:
            return tl
    return n_loc


def metric_loss(x, refs, *, mxu_dtype=None):
    """x: (bs, n_rkhs) f32; refs: list of (bs, n_rkhs, n_loc) arrays (or an already
    stacked (n_refs, bs, n_rkhs, n_loc) array) -> scalar f32 loss.

    Set mxu_dtype=jnp.bfloat16 on v6e/v7x for the fast MXU path (accumulation stays
    f32 via preferred_element_type); the default keeps exact f32 numerics."""
    if isinstance(refs, (list, tuple)):
        # Ideally the producer hands us the stacked tensor directly (no copy at all).
        refs = jnp.stack(refs, axis=0)
    n_refs, bs, n_rkhs, n_loc = refs.shape
    assert x.shape == (bs, n_rkhs)

    vmem_cap = _vmem_capacity_bytes()                     # 64 MiB on v7x, 128 on v5e/v6e
    tl = _pick_loc_tile(n_loc, n_rkhs, bs, budget_bytes=vmem_cap // 8)
    n_lt = n_loc // tl

    kernel = functools.partial(
        _metric_loss_kernel,
        inv_denom=1.0 / float(bs * n_loc),
        mxu_dtype=mxu_dtype,
    )

    out = pl.pallas_call(
        kernel,
        out_shape=jax.ShapeDtypeStruct((n_refs, 8, 128), jnp.float32),
        grid=(n_refs, n_lt, bs),
        in_specs=[
            # x is tiny and its block index never changes -> fetched once, stays resident.
            pl.BlockSpec((bs, n_rkhs), lambda r, lt, j: (0, 0)),
            # ref[r, j, :, lt*TL:(lt+1)*TL] as a clean 2-D (n_rkhs, TL) MXU operand,
            # read straight from the original layout (each element touched once).
            pl.BlockSpec((None, None, n_rkhs, tl), lambda r, lt, j: (r, j, 0, lt)),
        ],
        # Per-ref partial loss in a lane-dense (8, 128) tile: unmasked stores and no
        # shared accumulator, so n_refs can be sharded across TensorCores on v7x.
        out_specs=pl.BlockSpec((None, 8, 128), lambda r, lt, j: (r, 0, 0)),
        scratch_shapes=[
            pltpu.VMEM((bs, tl), jnp.float32),   # running max   (online logsumexp)
            pltpu.VMEM((bs, tl), jnp.float32),   # running sum   (online logsumexp)
            pltpu.VMEM((bs, tl), jnp.float32),   # per-ref (lse - correct) accumulator
        ],
        compiler_params=pltpu.CompilerParams(
            dimension_semantics=("parallel", "arbitrary", "arbitrary"),
            vmem_limit_bytes=min(vmem_cap // 2, 64 << 20),
        ),
    )(x, refs)
    return jnp.sum(out[:, 0, 0])


def metric_loss_reference(x, refs):
    """Pure-JAX transcription of the PyTorch forward, for verification."""
    total = jnp.float32(0.0)
    for ref in refs:
        bs, n_rkhs, n_loc = ref.shape
        ref_m = jnp.transpose(ref, (1, 0, 2)).reshape(n_rkhs, -1)    # (n_rkhs, bs*n_loc)
        score = (x @ ref_m) * 64.0                                    # (bs, bs*n_loc)
        score = score.reshape(bs, bs, n_loc).transpose(0, 2, 1).reshape(bs * n_loc, bs)
        labels = jnp.repeat(jnp.arange(bs), n_loc)
        lse = jax.scipy.special.logsumexp(score, axis=-1)
        picked = score[jnp.arange(bs * n_loc), labels]
        total = total + jnp.mean(lse - picked)
    return total


if __name__ == "__main__":
    bs, n_rkhs, n_loc, n_refs = 8, 64, 16, 3

    key = jax.random.PRNGKey(0)
    kx, *kr = jax.random.split(key, 1 + n_refs)
    x = jax.random.normal(kx, (bs, n_rkhs), dtype=jnp.float32)
    refs = [jax.random.normal(k, (bs, n_rkhs, n_loc), dtype=jnp.float32) for k in kr]

    loss = jax.block_until_ready(jax.jit(metric_loss)(x, refs))
    ref_loss = jax.block_until_ready(metric_loss_reference(x, refs))

    assert jnp.isfinite(loss), "kernel produced non-finite loss"
    assert jnp.allclose(loss, ref_loss, rtol=1e-4, atol=1e-3), (loss, ref_loss)
    print("KERNEL_OK")
</pallas_src>

<mosaic_0001>
module attributes {stable_mosaic.version = 11 : i64} {
  func.func @_metric_loss_kernel(%arg0: i32, %arg1: i32, %arg2: i32, %arg3: memref<8x64xf32, #tpu.memory_space<vmem>>, %arg4: memref<1x1x64x16xf32, #tpu.memory_space<vmem>>, %arg5: memref<1x8x128xf32, #tpu.memory_space<vmem>>, %arg6: memref<8x16xf32, #tpu.memory_space<vmem>>, %arg7: memref<8x16xf32, #tpu.memory_space<vmem>>, %arg8: memref<8x16xf32, #tpu.memory_space<vmem>>) attributes {dimension_semantics = [#tpu.dimension_semantics<parallel>, #tpu.dimension_semantics<arbitrary>, #tpu.dimension_semantics<arbitrary>], iteration_bounds = array<i64: 3, 1, 8>, scalar_prefetch = 0 : i64, scratch_operands = 3 : i64, tpu.core_type = #tpu.core_type<tc>, window_params = [{pipeline_mode = #tpu.pipeline_mode<synchronous>, transform_indices = @transform_0, window_bounds = array<i64: 8, 64>}, {transform_indices = @transform_1, window_bounds = array<i64: 1, 1, 64, 16>}, {transform_indices = @transform_2, window_bounds = array<i64: 1, 8, 128>}]} {
    %c0_i32 = arith.constant 0 : i32
    %0 = arith.cmpi eq, %arg1, %c0_i32 : i32
    %c0_i32_0 = arith.constant 0 : i32
    %1 = arith.cmpi eq, %arg2, %c0_i32_0 : i32
    %2 = arith.andi %0, %1 : i1
    %3 = arith.extui %2 : i1 to i32
    %c0_i32_1 = arith.constant 0 : i32
    %4 = arith.cmpi ne, %3, %c0_i32_1 : i32
    scf.if %4 {
      %cst_27 = arith.constant 0.000000e+00 : f32
      %43 = vector.broadcast %cst_27 : f32 to vector<8x16xf32>
      %c0_28 = arith.constant 0 : index
      %c0_29 = arith.constant 0 : index
      %44 = vector.load %arg8[%c0_28, %c0_29] : memref<8x16xf32, #tpu.memory_space<vmem>>, vector<8x16xf32>
      tpu.vector_store %arg8[%c0_28, %c0_29], %43 {strides = array<i32>} : memref<8x16xf32, #tpu.memory_space<vmem>>, vector<8x16xf32>,
    } else {
    }
    %c0_i32_2 = arith.constant 0 : i32
    %5 = arith.cmpi eq, %arg2, %c0_i32_2 : i32
    %6 = arith.extui %5 : i1 to i32
    %c0_i32_3 = arith.constant 0 : i32
    %7 = arith.cmpi ne, %6, %c0_i32_3 : i32
    scf.if %7 {
      %cst_27 = arith.constant 0xFF800000 : f32
      %43 = vector.broadcast %cst_27 : f32 to vector<8x16xf32>
      %c0_28 = arith.constant 0 : index
      %c0_29 = arith.constant 0 : index
      %44 = vector.load %arg6[%c0_28, %c0_29] : memref<8x16xf32, #tpu.memory_space<vmem>>, vector<8x16xf32>
      tpu.vector_store %arg6[%c0_28, %c0_29], %43 {strides = array<i32>} : memref<8x16xf32, #tpu.memory_space<vmem>>, vector<8x16xf32>,
      %cst_30 = arith.constant 0.000000e+00 : f32
      %45 = vector.broadcast %cst_30 : f32 to vector<8x16xf32>
      %c0_31 = arith.constant 0 : index
      %c0_32 = arith.constant 0 : index
      %46 = vector.load %arg7[%c0_31, %c0_32] : memref<8x16xf32, #tpu.memory_space<vmem>>, vector<8x16xf32>
      tpu.vector_store %arg7[%c0_31, %c0_32], %45 {strides = array<i32>} : memref<8x16xf32, #tpu.memory_space<vmem>>, vector<8x16xf32>,
    } else {
    }
    %c0 = arith.constant 0 : index
    %c0_4 = arith.constant 0 : index
    %8 = vector.load %arg3[%c0, %c0_4] : memref<8x64xf32, #tpu.memory_space<vmem>>, vector<8x64xf32>
    %c0_5 = arith.constant 0 : index
    %c0_6 = arith.constant 0 : index
    %c0_7 = arith.constant 0 : index
    %c0_8 = arith.constant 0 : index
    %9 = vector.load %arg4[%c0_5, %c0_6, %c0_7, %c0_8] : memref<1x1x64x16xf32, #tpu.memory_space<vmem>>, vector<1x1x64x16xf32>
    %10 = vector.shape_cast %9 : vector<1x1x64x16xf32> to vector<64x16xf32>
    %cst = arith.constant dense<0.000000e+00> : vector<8x16xf32>
    %11 = tpu.matmul %8, %10, %cst {dimension_numbers = #tpu.dot_dimension_numbers<[1], [0], [0], [1], [0, 0, 1, 1], [], []>} : vector<8x64xf32>, vector<64x16xf32>, vector<8x16xf32> -> vector<8x16xf32>
    %cst_9 = arith.constant 6.400000e+01 : f32
    %12 = vector.broadcast %cst_9 : f32 to vector<8x16xf32>
    %13 = arith.mulf %11, %12 : vector<8x16xf32>
    %c0_10 = arith.constant 0 : index
    %c0_11 = arith.constant 0 : index
    %14 = vector.load %arg6[%c0_10, %c0_11] : memref<8x16xf32, #tpu.memory_space<vmem>>, vector<8x16xf32>
    %15 = arith.maximumf %14, %13 : vector<8x16xf32>
    %c0_12 = arith.constant 0 : index
    %c0_13 = arith.constant 0 : index
    %16 = vector.load %arg7[%c0_12, %c0_13] : memref<8x16xf32, #tpu.memory_space<vmem>>, vector<8x16xf32>
    %17 = arith.subf %14, %15 : vector<8x16xf32>
    %18 = math.exp %17 : vector<8x16xf32>
    %19 = arith.mulf %16, %18 : vector<8x16xf32>
    %20 = arith.subf %13, %15 : vector<8x16xf32>
    %21 = math.exp %20 : vector<8x16xf32>
    %22 = arith.addf %19, %21 : vector<8x16xf32>
    %c0_14 = arith.constant 0 : index
    %c0_15 = arith.constant 0 : index
    %23 = vector.load %arg7[%c0_14, %c0_15] : memref<8x16xf32, #tpu.memory_space<vmem>>, vector<8x16xf32>
    tpu.vector_store %arg7[%c0_14, %c0_15], %22 {strides = array<i32>} : memref<8x16xf32, #tpu.memory_space<vmem>>, vector<8x16xf32>,
    %c0_16 = arith.constant 0 : index
    %c0_17 = arith.constant 0 : index
    %24 = vector.load %arg6[%c0_16, %c0_17] : memref<8x16xf32, #tpu.memory_space<vmem>>, vector<8x16xf32>
    tpu.vector_store %arg6[%c0_16, %c0_17], %15 {strides = array<i32>} : memref<8x16xf32, #tpu.memory_space<vmem>>, vector<8x16xf32>,
    %25 = tpu.iota {dimensions = array<i32: 0>} : vector<8x1xi32>
    %26 = vector.broadcast %arg2 : i32 to vector<8x1xi32>
    %27 = arith.cmpi eq, %25, %26 : vector<8x1xi32>
    %c0_18 = arith.constant 0 : index
    %c0_19 = arith.constant 0 : index
    %28 = vector.load %arg8[%c0_18, %c0_19] : memref<8x16xf32, #tpu.memory_space<vmem>>, vector<8x16xf32>
    %cst_20 = arith.constant 0.000000e+00 : f32
    %29 = vector.shape_cast %27 : vector<8x1xi1> to vector<8x1xi1>
    %30 = vector.broadcast %29 : vector<8x1xi1> to vector<8x16xi1>
    %31 = vector.broadcast %cst_20 : f32 to vector<8x16xf32>
    %32 = arith.select %30, %13, %31 : vector<8x16xi1>, vector<8x16xf32>
    %33 = arith.subf %28, %32 : vector<8x16xf32>
    %c0_21 = arith.constant 0 : index
    %c0_22 = arith.constant 0 : index
    %34 = vector.load %arg8[%c0_21, %c0_22] : memref<8x16xf32, #tpu.memory_space<vmem>>, vector<8x16xf32>
    tpu.vector_store %arg8[%c0_21, %c0_22], %33 {strides = array<i32>} : memref<8x16xf32, #tpu.memory_space<vmem>>, vector<8x16xf32>,
    %c7_i32 = arith.constant 7 : i32
    %35 = arith.cmpi eq, %arg2, %c7_i32 : i32
    %36 = arith.extui %35 : i1 to i32
    %c0_i32_23 = arith.constant 0 : i32
    %37 = arith.cmpi ne, %36, %c0_i32_23 : i32
    scf.if %37 {
      %c0_27 = arith.constant 0 : index
      %c0_28 = arith.constant 0 : index
      %43 = vector.load %arg8[%c0_27, %c0_28] : memref<8x16xf32, #tpu.memory_space<vmem>>, vector<8x16xf32>
      %c0_29 = arith.constant 0 : index
      %c0_30 = arith.constant 0 : index
      %44 = vector.load %arg6[%c0_29, %c0_30] : memref<8x16xf32, #tpu.memory_space<vmem>>, vector<8x16xf32>
      %c0_31 = arith.constant 0 : index
      %c0_32 = arith.constant 0 : index
      %45 = vector.load %arg7[%c0_31, %c0_32] : memref<8x16xf32, #tpu.memory_space<vmem>>, vector<8x16xf32>
      %46 = math.log %45 : vector<8x16xf32>
      %47 = arith.addf %44, %46 : vector<8x16xf32>
      %48 = arith.addf %43, %47 : vector<8x16xf32>
      %c0_33 = arith.constant 0 : index
      %c0_34 = arith.constant 0 : index
      %49 = vector.load %arg8[%c0_33, %c0_34] : memref<8x16xf32, #tpu.memory_space<vmem>>, vector<8x16xf32>
      tpu.vector_store %arg8[%c0_33, %c0_34], %48 {strides = array<i32>} : memref<8x16xf32, #tpu.memory_space<vmem>>, vector<8x16xf32>,
    } else {
    }
    %c0_i32_24 = arith.constant 0 : i32
    %38 = arith.cmpi eq, %arg1, %c0_i32_24 : i32
    %c7_i32_25 = arith.constant 7 : i32
    %39 = arith.cmpi eq, %arg2, %c7_i32_25 : i32
    %40 = arith.andi %38, %39 : i1
    %41 = arith.extui %40 : i1 to i32
    %c0_i32_26 = arith.constant 0 : i32
    %42 = arith.cmpi ne, %41, %c0_i32_26 : i32
    scf.if %42 {
      %cst_27 = arith.constant 0.000000e+00 : f32
      %43 = vector.broadcast %cst_27 : f32 to vector<8x128xf32>
      %c0_28 = arith.constant 0 : index
      %c0_29 = arith.constant 0 : index
      %44 = vector.load %arg8[%c0_28, %c0_29] : memref<8x16xf32, #tpu.memory_space<vmem>>, vector<8x16xf32>
      %45 = vector.shape_cast %44 : vector<8x16xf32> to vector<1x8x16xf32>
      %cst_30 = arith.constant dense<0.000000e+00> : vector<1xf32>
      %46 = vector.multi_reduction <add>, %45, %cst_30 [1, 2] : vector<1x8x16xf32> to vector<1xf32>
      %47 = vector.shape_cast %46 : vector<1xf32> to vector<1x1x1xf32>
      %48 = vector.extract %47[0, 0, 0] : f32 from vector<1x1x1xf32>
      %cst_31 = arith.constant 7.812500e-03 : f32
      %49 = arith.mulf %48, %cst_31 : f32
      %50 = vector.broadcast %49 : f32 to vector<8x128xf32>
      %51 = arith.addf %43, %50 : vector<8x128xf32>
      %c0_32 = arith.constant 0 : index
      %c0_33 = arith.constant 0 : index
      %c0_34 = arith.constant 0 : index
      %52 = vector.load %arg5[%c0_32, %c0_33, %c0_34] : memref<1x8x128xf32, #tpu.memory_space<vmem>>, vector<1x8x128xf32>
      %53 = vector.shape_cast %52 : vector<1x8x128xf32> to vector<8x128xf32>
      %54 = vector.shape_cast %51 : vector<8x128xf32> to vector<1x8x128xf32>
      tpu.vector_store %arg5[%c0_32, %c0_33, %c0_34], %54 {strides = array<i32>} : memref<1x8x128xf32, #tpu.memory_space<vmem>>, vector<1x8x128xf32>,
    } else {
    }
    return
  }
  func.func @transform_0(%arg0: i32, %arg1: i32, %arg2: i32) -> (i32, i32) {
    %c0_i32 = arith.constant 0 : i32
    %c0_i32_0 = arith.constant 0 : i32
    %c0_i32_1 = arith.constant 0 : i32
    return %c0_i32, %c0_i32_0 : i32, i32
  }
  func.func @transform_1(%arg0: i32, %arg1: i32, %arg2: i32) -> (i32, i32, i32, i32) {
    %c0_i32 = arith.constant 0 : i32
    %c0_i32_0 = arith.constant 0 : i32
    return %arg0, %arg2, %c0_i32, %arg1 : i32, i32, i32, i32
  }
  func.func @transform_2(%arg0: i32, %arg1: i32, %arg2: i32) -> (i32, i32, i32) {
    %c0_i32 = arith.constant 0 : i32
    %c0_i32_0 = arith.constant 0 : i32
    %c0_i32_1 = arith.constant 0 : i32
    return %arg0, %c0_i32, %c0_i32_0 : i32, i32, i32
  }
}

</mosaic_0001>

<bundles_post_ra>
// kernel: metric_loss.1
= control target key start
LH: loop header
LB: loop body
LE: loop exit
PB: predicated region body
PF: predicated region fallthrough
CT: control target
= control target key end

     0   :  { %s1161_s0 = inlined_call_operand.hbm [shape: f32[8,64], index: 0, kind: input, shape index: {}]   ;;  %s1162_s1 = inlined_call_operand.hbm [shape: f32[3,8,64,16], index: 1, kind: input, shape index: {}]   ;;  %s1163_s2 = inlined_call_operand.hbm [shape: f32[3,8,128], index: 2, kind: output, shape index: {}]  }
   0x1   :  { %1174 = sst [smem:[#allocation18_spill]] %s1161_s0 }
   0x2   :  { %7 = vsyncpa [#allocation6], 0 }
   0x3   :  { %8 = vsyncpa [#allocation9], 0 }
   0x4   :  { %10 = vsyncpa [#allocation9 + $0x1], 0 }
   0x5   :  { %11 = vsyncpa [#allocation7], 0 }
   0x6   :  { %13 = vsyncpa [#allocation7 + $0x1], 0  ;;  %s873_s9 = smov 0   ;;  %s875_s10 = smov 0  }
   0x7   :  { %s877_s11 = smov 0   ;;  %s879_s12 = smov 0  }
   0x8   :  { %s881_s13 = smov 0   ;;  %s883_s14 = smov 0  }
   0x9   :  { %s885_s15 = smov 0   ;;  %s887_s16 = smov 0  }
   0xa   :  { %s889_s17 = smov 0   ;;  %s891_s18 = smov 0  }
   0xb   :  { %s893_s19 = smov 0  }
   0xc LB: > { %1175 = sst [smem:[#allocation14_spill]] %s837_s17  ;;  %s468_s20 = sadd.s32 4294967295, %s845_s19   ;;  %s845_s19 = sphi %s893_s19, %s19_s19   ;;  %s841_s18 = sphi %s891_s18, %s1207_s18   ;;  %s837_s17 = sphi %s889_s17, %s1198_s17   ;;  %s833_s16 = sphi %s887_s16, %s1206_s16   ;;  %s829_s15 = sphi %s885_s15, %s1197_s15   ;;  %s825_s14 = sphi %s883_s14, %s1205_s14   ;;  %s821_s13 = sphi %s881_s13, %s1204_s13   ;;  %s817_s12 = sphi %s879_s12, %s1203_s12   ;;  %s813_s11 = sphi %s877_s11, %s1202_s11   ;;  %s809_s10 = sphi %s875_s10, %s1201_s10   ;;  %s805_s9 = sphi %s873_s9, %s1200_s9  }
   0xd   : > { %s469_s21 = sadd.s32 4294967294, %s845_s19   ;;  %p77_p0 = scmp.ne.s32.totalorder %s825_s14, %s821_s13 }
   0xe   : > { %p78_p1 = scmp.eq.s32.totalorder %s845_s19, 0  ;;  %p83_p2 = scmp.ne.s32.totalorder %s821_s13, %s817_s12 }
   0xf   : > { %p933_p3 = scmp.eq.s32.totalorder %s468_s20, 0  ;;  %p106_p5 = scmp.ne.s32.totalorder %s813_s11, %s809_s10 }
  0x10   : > { %p938_p4 = por %p78_p1, %p77_p0  ;;  %p107_p7 = scmp.eq.s32.totalorder %s468_s20, 23 }
  0x11   : > { %s1176_s23 = scalar_select %p933_p3, 1, 0 }
  0x12   : > { %p946_p6 = por %p933_p3, %p83_p2  ;;  %p112_p8 = scmp.ne.s32.totalorder %s809_s10, %s805_s9 }
  0x13   : > { %p113_p9 = scmp.eq.s32.totalorder %s469_s21, 23  ;;  %p952_p10 = por %p107_p7, %p106_p5 }
  0x14   : > { %s1178_s26 = scalar_select %p946_p6, 1, 0 }
  0x15   : > { %s1179_s27 = scalar_select %p952_p10, 1, 0 }
  0x16   : > { %p470_p11 = scmp.ge.s32.totalorder %s845_s19, 1  ;;  %p957_p12 = por %p113_p9, %p112_p8 }
  0x17   : > { %p120_p13 = scmp.lt.s32.totalorder %s845_s19, 25  ;;  %s847_s30 = smov [#allocation5]  }
  0x18   : > { %s1180_s28 = scalar_select %p957_p12, 1, 0 }
  0x19   : > { %p962_p0 = pnand %p470_p11, %p120_p13  ;;  %s133_s3 = sshll.u32 %s847_s30, 4  ;;  %s134_s3 = int_to_ptr.vmem [resolvable:$true] %s133_s3 }
  0x1a   : > { %1181 = sst [smem:[#allocation15_spill]] %s1180_s28  ;;  %p555_p2 = scmp.lt.s32.totalorder %s845_s19, 24 }
  0x1b   : > { %s1182_s29 = scalar_select %p962_p0, 1, 0 }
  0x1c   : > { %p542_p1 = pneg %p962_p0  ;;  %p977_p7 = pnand %p555_p2, %p938_p4 }
  0x1d   : > { %s1185_s0 = sld [smem:[#allocation18_spill]] }
  0x1e   : > { %p971_p5 = pnand %p542_p1, %p933_p3 }
  0x1f   : > { %s1184_s5 = scalar_select %p977_p7, 1, 0 }
  0x20   : > { %p663_p9 = pneg %p971_p5 }
  0x23   : > { %s661_s8 = scalar_lea.hbm %s1185_s0, 128 }
  0x24   : > { %p662_p8 = scmp.ne.s32.totalorder %s1185_s0, %s661_s8  ;;  %p668_p1 = scmp.lt.u32.totalorder %s661_s8, %s1185_s0 }
  0x26   : > { %p664_p11 = pnand %p663_p9, %p662_p8 }
  0x28   : > { %p665_p13 = pneg %p664_p11 }
  0x2a   : > { %p670_p4 = pnand %p668_p1, %p665_p13 }
  0x2c   : > { %673 = shalt.err (!%p670_p4)
}
  0x2d   : > { %s674_s25 = scalar_lea.vmem %s134_s3, 128  ;;  %p682_p6 = scmp.lt.s32.totalorder %s134_s3, %s134_s3 }
  0x2e   : > { %p675_p2 = scmp.ne.s32.totalorder %s134_s3, %s674_s25  ;;  %p683_p3 = scmp.lt.s32.totalorder %s674_s25, %s674_s25 }
  0x30   : > { %p677_p12 = pnand %p675_p2, %p663_p9  ;;  %p684_p0 = por %p683_p3, %p682_p6 }
  0x32   : > { %p678_p10 = pneg %p677_p12 }
  0x34   : > { %p685_p7 = pnand %p684_p0, %p678_p10 }
  0x36   : > { %688 = shalt.err (!%p685_p7)
}
  0x37   : > { %545 = dma.hbm_to_vmem [thread:$0]  (!%p971_p5), %s1185_s0, 128, %s134_s3, [#allocation6]  }
  0x38   : > { %s31_s8 = sadd.s32 1, %s837_s17  ;;  %s38_s12 = sadd.s32 1, %s841_s18 }
  0x39   : > { %p32_p12 = scmp.ge.s32.totalorder %s31_s8, 8  ;;  %s144_s20 = sand.u32 1, %s825_s14  }
  0x3a   : > { %s473_s21 = sshll.u32 %s144_s20, 6  ;;  %s474_s30 = sshll.u32 %s837_s17, 3 }
  0x3b   : > { %s1209_s8 = smov (%p32_p12, %s31_s8), 0  ;;  %s1211_s12 = smov (!%p32_p12, %s38_s12), %s841_s18 }
  0x3c   : > { %1186 = sst [smem:[#allocation16_spill]] %s1209_s8  ;;  %s64_s4 = ssub.s32 %s837_s17, %s1209_s8 }
  0x3d   : > { %p40_p3 = scmp.ge.s32.totalorder %s1211_s12, 3  ;;  %s475_s25 = sshll.u32 %s841_s18, 6 }
  0x3e   : > { %s148_s6 = scalar_lea.vmem [#allocation8], %s473_s21  ;;  %s155_s7 = sadd.s32 %s475_s25, %s474_s30 }
  0x3f   : > { %s158_s3 = sshll.u32 %s148_s6, 4  ;;  %s1213_s12 = smov (%p40_p3, %s1211_s12), 0  ;;  %s1009_s3 = int_to_ptr.vmem [resolvable:$true] %s158_s3 }
  0x40   : > { %1187 = sst [smem:[#allocation17_spill]] %s1213_s12  ;;  %s63_s22 = ssub.s32 %s841_s18, %s1213_s12 }
  0x41   : > { %s476_s24 = sshll.u32 %s155_s7, 7  ;;  %s65_s0 = sor.u32 %s64_s4, %s63_s22 }
  0x42   : > { %p94_p6 = scmp.eq.s32.totalorder %s63_s22, 0  ;;  %p68_p10 = scmp.eq.s32.totalorder %s65_s0, 0 }
  0x43   : > { %s1016_s17 = scalar_lea.hbm %s1162_s1, %s476_s24  ;;  %s1188_s21 = sadd.s32 1, %s813_s11 }
  0x44   : > { %s1021_s6 = scalar_select %p94_p6, %s813_s11, %s1188_s21  }
  0x45   : > { %s1189_s30 = sadd.s32 1, %s825_s14  ;;  %s1028_s12 = scalar_lea.sflag [#allocation9], %s144_s20 }
  0x46   : > { %s1026_s25 = scalar_select %p68_p10, %s825_s14, %s1189_s30  }
  0x47   : > { %s689_s4 = scalar_lea.hbm %s1016_s17, 1024  ;;  %p1190_p5 = scmp.ne.s32.totalorder %s1184_s5, 0 }
  0x48   : > { %p690_p0 = scmp.ne.s32.totalorder %s1016_s17, %s689_s4  ;;  %s694_s24 = scalar_lea.hbm %s1162_s1, 24576 }
  0x49   : > { %p691_p7 = pneg %p1190_p5  ;;  %p695_p11 = scmp.lt.u32.totalorder %s1016_s17, %s1162_s1 }
  0x4a   : > { %p696_p13 = scmp.lt.u32.totalorder %s694_s24, %s689_s4  ;;  %p698_p4 = scmp.lt.u32.totalorder %s689_s4, %s1016_s17 }
  0x4b   : > { %p692_p8 = pnand %p691_p7, %p690_p0 }
  0x4c   : > { %p697_p1 = por %p696_p13, %p695_p11 }
  0x4d   : > { %p693_p9 = pneg %p692_p8 }
  0x4e   : > { %p699_p2 = por %p698_p4, %p697_p1 }
  0x50   : > { %p700_p12 = pnand %p699_p2, %p693_p9 }
  0x52   : > { %703 = shalt.err (!%p700_p12)
}
  0x53   : > { %s704_s20 = scalar_lea.vmem %s1009_s3, 1024  ;;  %s848_s7 = smov [#allocation8]  }
  0x54   : > { %p705_p3 = scmp.ne.s32.totalorder %s1009_s3, %s704_s20  ;;  %s709_s21 = sshll.u32 %s848_s7, 4  ;;  %s710_s21 = int_to_ptr.vmem [resolvable:$false] %s709_s21 }
  0x55   : > { %s711_s30 = scalar_lea.vmem %s710_s21, 2048  ;;  %p712_p0 = scmp.lt.s32.totalorder %s1009_s3, %s710_s21 }
  0x56   : > { %p707_p6 = pnand %p705_p3, %p691_p7  ;;  %p713_p8 = scmp.lt.s32.totalorder %s711_s30, %s704_s20 }
  0x58   : > { %p708_p10 = pneg %p707_p6  ;;  %p714_p11 = por %p713_p8, %p712_p0 }
  0x5a   : > { %p715_p13 = pnand %p714_p11, %p708_p10 }
  0x5c   : > { %718 = shalt.err (!%p715_p13)
}
  0x5d   : > { %s849_s4 = smov 128   ;;  %s850_s0 = smov 8  }
  0x5e   : > { %549 = dma.hbm_to_vmem [thread:$0]  (!%p1190_p5), %s1016_s17, 1024, %s1009_s3, %s1028_s12, %s849_s4, %s849_s4, %s850_s0  }
  0x5f   : > { %p1191_p7 = scmp.ne.s32.totalorder %s1182_s29, 0 }
  0x60   : > { %p1192_p9 = scmp.ne.s32.totalorder (!%p1191_p7), %s1176_s23, 0 }
  0x61   : > { %170 = sbr.rel (%p1191_p7) target bundleno = 647 (0x287), region = 28 }
  0x68   : > { %792 = dma.done.wait (%p1192_p9), [#allocation6], 128  }
  0x69   : > { %794 = vsyncadd (%p1192_p9), [#allocation6], 4294967168  ;;  %s176_s22 = sand.u32 1, %s821_s13   ;;  %p1193_p1 = scmp.ne.s32.totalorder %s1178_s26, 0 }
  0x6a   : > { %s479_s24 = sshll.u32 %s176_s22, 6  ;;  %s177_s28 = scalar_lea.sflag [#allocation9], %s176_s22 }
  0x6b   : > { %s1063_s8 = scalar_lea.vmem [#allocation8], %s479_s24 }
  0x6c   : > { %796 = dma.done.wait (%p1193_p1), %s177_s28, 1024  }
  0x6d   : > { %798 = vsyncadd (%p1193_p1), %s177_s28, 4294966272  ;;  %s198_s17 = sand.u32 1, %s809_s10   ;;  %p202_p5 = scmp.eq.s32.totalorder %s829_s15, 0 }
  0x6e   : > { %s1073_s23 = sshll.u32 %s198_s17, 3  ;;  %vm207_vm0 = vcmask (%p202_p5), 130048   ;;  %v851_v0 = vmov (%p202_p5), 0.0  }
  0x6f   : > { %s200_s29 = scalar_lea.vmem [#allocation10], %s1073_s23  ;;  %206 = sbr.rel (!%p202_p5) target bundleno = 118 (0x76), region = 40  ;;  %208 = vst.msk [vmem:[#allocation4] sm:$0xff] (%p202_p5), %vm207_vm0, %v851_v0 }
  0x76 PF: > { %p482_p4 = scmp.ne.s32.totalorder %s829_s15, 0 }
  0x77   : > { %vm212_vm1 = vcmask (!%p482_p4), 130048   ;;  %v852_v1 = vmov (!%p482_p4), -inf   ;;  %v853_v2 = vmov (!%p482_p4), 0.0  }
  0x78   : > { %211 = sbr.rel (%p482_p4) target bundleno = 127 (0x7f), region = 44  ;;  %213 = vst.msk [vmem:[#allocation2] sm:$0xff] (!%p482_p4), %vm212_vm1, %v852_v1  ;;  %214 = vst.msk [vmem:[#allocation3] sm:$0xff] (!%p482_p4), %vm212_vm1, %v853_v2 }
  0x7f PF: > { %v216_v3 = vld [vmem:[%s1063_s8] sm:$0xff]  ;;  %v217_v4 = vld [vmem:[%s1063_s8 + $0x8] sm:$0xff]  ;;  %v218_v5 = vld [vmem:[%s1063_s8 + $0x10] sm:$0xff]  ;;  %v854_v6 = vmov 0.0|0.0   ;;  %vm855_vm2 = vmmov 0   ;;  %v856_v9 = vmov 0.0   ;;  %v313_v18 = vlaneseq }
  0x80   : > { %520 = vmatprep.subr.bf16.mxu0 %v854_v6  ;;  %v521_v7 = vpack.c.bf16 %v217_v4, %v216_v3  ;;  %v219_v8 = vld [vmem:[%s1063_s8 + $0x18] sm:$0xff]  ;;  %517 = vmatprep.mubr.msk.f32.mxu0 %vm855_vm2, %v856_v9  ;;  %v220_v11 = vld [vmem:[%s1063_s8 + $0x20] sm:$0xff]  ;;  %v221_v12 = vld [vmem:[%s1063_s8 + $0x28] sm:$0xff]  ;;  %vm224_vm3 = vcmask 523264   ;;  %p323_p2 = scmp.eq.s32.totalorder %s829_s15, 7  ;;  %v315_v20 = vstv %s829_s15  ;;  %vm310_vm5 = vcmask 130048  }
  0x81   : > { %v524_v10 = vpack.c.bf16 %v219_v8, %v218_v5  ;;  %v527_v13 = vpack.c.bf16 %v221_v12, %v220_v11  ;;  %v222_v14 = vld [vmem:[%s1063_s8 + $0x30] sm:$0xff]  ;;  %v223_v15 = vld [vmem:[%s1063_s8 + $0x38] sm:$0xff]  ;;  %v314_v19 = vshrl.u32 %v313_v18, 7  ;;  %v299_v22 = vld [vmem:[#allocation2] sm:$0xff]  ;;  %p484_p12 = scmp.ne.s32.totalorder %s829_s15, 7 }
  0x82   : > { %522 = vmatpush3.bf16.msra.mxu0 %v521_v7  ;;  %v530_v16 = vpack.c.bf16 %v223_v15, %v222_v14  ;;  %v215_v17 = vld [vmem:[#allocation5] sm:$0xff]  ;;  %v317_v24 = vld [vmem:[#allocation4] sm:$0xff]  ;;  %v301_v33 = vld [vmem:[#allocation3] sm:$0xff] }
  0x83   : > { %523 = vmatprep.subr.bf16.mxu0 %v854_v6  ;;  %vm316_vm4 = vcmp.eq.s32.totalorder %v314_v19, %v315_v20 }
  0x86   : > { %525 = vmatpush3.bf16.msra.mxu0 %v524_v10 }
  0x87   : > { %526 = vmatprep.subr.bf16.mxu0 %v854_v6 }
  0x8a   : > { %528 = vmatpush3.bf16.msra.mxu0 %v527_v13 }
  0x8b   : > { %529 = vmatprep.subr.bf16.mxu0 %v854_v6 }
  0x8e   : > { %531 = vmatpush3.bf16.msra.mxu0 %v530_v16 }
  0x91   : > { %518 = vmatmul.mubr.msk.f32.vlgmr.msra.gmra.mrb[0].mxu0 %vm224_vm3, %v215_v17 }
 0x164   : > { %v294_v21 = vpop.f32.mrb[0].mxu0 }
 0x165   : > { %v298_v23 = vmul.f32 64.0, %v294_v21  ;;  %v519_v25 = vpop.f32.mrb[1].mxu0 }
 0x167   : > { %v300_v26 = vmax.f32 %v299_v22, %v298_v23  ;;  %v320_v27 = vsel %vm316_vm4, %v298_v23, 0.0 }
 0x168   : > { %v321_v28 = vsub.f32 %v317_v24, %v320_v27 }
 0x169   : > { %v302_v29 = vsub.f32 %v299_v22, %v300_v26  ;;  %v306_v30 = vsub.f32 %v298_v23, %v300_v26  ;;  %312 = vst.msk [vmem:[#allocation2] sm:$0xff] %vm310_vm5, %v300_v26 }
 0x16a   : > { %322 = vst.msk [vmem:[#allocation4] sm:$0xff] %vm310_vm5, %v321_v28 }
 0x16b   : > { %v303_v31 = vmul.f32 1.442695, %v302_v29  ;;  %v307_v32 = vmul.f32 1.442695, %v306_v30 }
 0x16d   : > { %655 = vpow2.f32 %v303_v31 }
 0x16e   : > { %657 = vpow2.f32 %v307_v32 }
 0x170   : > { %v328_v40 = vld [vmem:[#allocation2] sm:$0xff] (!%p484_p12) }
 0x171   : > { %v327_v42 = vld [vmem:[#allocation4] sm:$0xff] (!%p484_p12) }
 0x176   : > { %326 = sbr.rel (%p484_p12) target bundleno = 406 (0x196), region = 48 }
 0x177   : > { %v656_v34 = vpop.eup %655 }
 0x178   : > { %v305_v35 = vmul.f32 %v656_v34, %v301_v33  ;;  %v658_v36 = vpop.eup %657 }
 0x17a   : > { %v309_v37 = vadd.f32 %v658_v36, %v305_v35 }
 0x17c   : > { %311 = vst.msk [vmem:[#allocation3] sm:$0xff] %vm310_vm5, %v309_v37 }
 0x183   : > { %v329_v38 = vld [vmem:[#allocation3] sm:$0xff] }
 0x184   : > { %659 = vlog2.f32 %v329_v38 }
 0x18e   : > { %v660_v39 = vpop.eup %659 }
 0x18f   : > { %v331_v41 = vmul.f32 0.6931472, %v660_v39 }
 0x191   : > { %v332_v43 = vadd.f32 %v331_v41, %v328_v40 }
 0x193   : > { %v333_v44 = vadd.f32 %v332_v43, %v327_v42 }
 0x195   : > { %334 = vst.msk [vmem:[#allocation4] sm:$0xff] %vm310_vm5, %v333_v44 }
 0x196 PF: > { %338 = sbr.rel (!%p323_p2) target bundleno = 622 (0x26e), region = 52 }
 0x19c   : > { %v339_v45 = vld [vmem:[#allocation4] sm:$0xff] (%p323_p2) }
 0x19d   : > { %v340_v46 = vsel %vm310_vm5, %v339_v45, 0.0 }
 0x19e   : > { %341 = vadd.xlane.f32.xlu0 %v340_v46 }
 0x22b   : > { %v342_v47 = vpop.xlane.xlu0 %341 }
 0x22c   : > { %v343_v48 = vrot.slane %v342_v47, 4 }
 0x22e   : > { %v344_v49 = vadd.f32 %v343_v48, %v342_v47 }
 0x230   : > { %v345_v50 = vrot.slane %v344_v49, 2 }
 0x232   : > { %v346_v51 = vadd.f32 %v345_v50, %v344_v49 }
 0x234   : > { %v347_v52 = vrot.slane %v346_v51, 1 }
 0x236   : > { %v348_v53 = vadd.f32 %v347_v52, %v346_v51 }
 0x238   : > { %532 = vpush %v348_v53 }
 0x269   : > { %s533_s26 = spop %532 }
 0x26a   : > { %s350_s5 = smul.f32 0.0078125, %s533_s26 }
 0x26c   : > { %v351_v54 = vstv %s350_s5 }
 0x26d   : > { %353 = vst [vmem:[%s200_s29] sm:$0xff] %v351_v54 }
 0x26e PF: > { %s487_s15 = sshll.u32 %s833_s16, 7  ;;  %s368_s7 = sshll.u32 %s200_s29, 4  ;;  %s369_s7 = int_to_ptr.vmem [resolvable:$true] %s368_s7 }
 0x26f   : > { %s1101_s20 = scalar_lea.hbm %s1163_s2, %s487_s15  ;;  %s355_s21 = scalar_lea.sflag [#allocation7], %s198_s17 }
 0x270   : > { %s719_s30 = scalar_lea.vmem %s369_s7, 128  ;;  %p1194_p6 = scmp.ne.s32.totalorder %s1179_s27, 0 }
 0x271   : > { %p720_p3 = scmp.ne.s32.totalorder %s369_s7, %s719_s30  ;;  %s857_s4 = smov [#allocation10]  }
 0x272   : > { %s723_s0 = sshll.u32 %s857_s4, 4  ;;  %s724_s0 = int_to_ptr.vmem [resolvable:$false] %s723_s0 }
 0x273   : > { %p721_p10 = pnand %p720_p3, %p1194_p6  ;;  %s725_s22 = scalar_lea.vmem %s724_s0, 256 }
 0x274   : > { %p726_p8 = scmp.lt.s32.totalorder %s369_s7, %s724_s0  ;;  %p727_p11 = scmp.lt.s32.totalorder %s725_s22, %s719_s30 }
 0x275   : > { %p722_p0 = pneg %p721_p10 }
 0x276   : > { %p728_p13 = por %p727_p11, %p726_p8 }
 0x278   : > { %p729_p7 = pnand %p728_p13, %p722_p0 }
 0x27a   : > { %732 = shalt.err (!%p729_p7)
}
 0x27b   : > { %s733_s16 = scalar_lea.hbm %s1101_s20, 128  ;;  %s737_s8 = scalar_lea.hbm %s1163_s2, 384 }
 0x27c   : > { %p734_p9 = scmp.ne.s32.totalorder %s1101_s20, %s733_s16  ;;  %p738_p4 = scmp.lt.u32.totalorder %s1101_s20, %s1163_s2 }
 0x27d   : > { %p739_p2 = scmp.lt.u32.totalorder %s737_s8, %s733_s16  ;;  %p741_p3 = scmp.lt.u32.totalorder %s733_s16, %s1101_s20 }
 0x27e   : > { %p735_p1 = pnand %p734_p9, %p1194_p6 }
 0x27f   : > { %p740_p12 = por %p739_p2, %p738_p4 }
 0x280   : > { %p736_p5 = pneg %p735_p1 }
 0x281   : > { %p742_p10 = por %p741_p3, %p740_p12 }
 0x283   : > { %p743_p0 = pnand %p742_p10, %p736_p5 }
 0x285   : > { %746 = shalt.err (!%p743_p0)
}
 0x286   : > { %540 = dma.vmem_to_hbm [thread:$0]  (%p1194_p6), %s369_s7, 128, %s1101_s20, %s355_s21  }
 0x287 PF: > { %s1195_s29 = sld [smem:[#allocation15_spill]]  ;;  %p557_p8 = scmp.ge.s32.totalorder %s845_s19, 2 }
 0x288   : > { %s380_s26 = sand.u32 1, %s805_s9  }
 0x289   : > { %s381_s5 = scalar_lea.sflag [#allocation7], %s380_s26 }
 0x28d   : > { %p1196_p11 = scmp.ne.s32.totalorder %s1195_s29, 0 }
 0x28f   : > { %p551_p13 = pnand %p557_p8, %p1196_p11 }
 0x291   : > { %800 = dma.done.wait (!%p551_p13), %s381_s5, 128  }
 0x292   : > { %802 = vsyncadd (!%p551_p13), %s381_s5, 4294967168  ;;  %s19_s19 = sadd.s32 1, %s845_s19   ;;  %s1197_s15 = sld [smem:[#allocation14_spill]] }
 0x293   : > { %p16_p7 = scmp.ge.s32.totalorder %s19_s19, 26   ;;  %s1198_s17 = sld [smem:[#allocation16_spill]] }
 0x294   : > { %s1199_s27 = sld [smem:[#allocation17_spill]]  ;;  %s1200_s9 = smov %s809_s10 }
 0x295   : > { %s1201_s10 = smov %s813_s11  ;;  %s1202_s11 = smov %s1021_s6 }
 0x296   : > { %s1203_s12 = smov %s821_s13  ;;  %s1204_s13 = smov %s825_s14 }
 0x297   : > { %s1205_s14 = smov %s1026_s25  ;;  %s1206_s16 = smov %s841_s18 }
 0x298   :  { %18 = sbr.rel (!%p16_p7) target bundleno = 12 (0xc), region = 94 }
 0x29a   : > { %s1207_s18 = smov %s1199_s27 }
 0x29f   :  { %386 = vsyncpa [#allocation6], 1 }
 0x2a0   :  { %388 = vsyncpa [#allocation6 + $0x1], 1 }
 0x2a1   :  { %389 = vsyncpa [#allocation9], 1 }
 0x2a2   :  { %391 = vsyncpa [#allocation9 + $0x1], 1 }
 0x2a3   :  { %392 = vsyncpa [#allocation7], 1 }
 0x2a4   :  { %394 = vsyncpa [#allocation7 + $0x1], 1 }

</bundles_post_ra>
